<compile_context>
chip_gen: v6e
topology: v6e:2x2x1
jax: 0.10.0
libtpu: 0.0.40
codegen_flags: <defaults>
</compile_context>

<pallas_src>
import jax
import jax.numpy as jnp
from jax.experimental import pallas as pl
from jax.experimental.pallas import tpu as pltpu

# ---- static problem sizes --------------------------------------------------
B_IN = 8                    # len(x)
B_AUX = 8                   # len(x_aux)
B_TOTAL = B_IN + B_AUX
C, H, W = 4, 8, 8
D_IN = C * H * W            # 256
HIDDEN = 128
NUM_CLASSES = 10
LANES = 128                 # lane-padded classifier width (lane-dense output)
STATS_ROWS = 8              # one 8x128 tile for the packed scalar stats
OUT_ROWS = B_IN + STATS_ROWS
BETA = 2.0
OOD_WEIGHT = 0.5

# lane indices of the packed stats row (row B_IN of the output slab)
S_IN_LOSS, S_ACC, S_OOD_LOSS, S_LOSS, S_E_IN, S_E_OUT, S_NAN = range(7)


def trainer_fwd_kernel(y_ref, xin_ref, xaux_ref, w1_ref, b_ref, w2_hbm_ref,
                       out_ref, w2_vmem, dma_sem):
    # ---- kick off the classifier-weight DMA; hide it under the first matmul
    # and the Hopfield Gram (waited on only right before the classifier dot).
    w2_cp = pltpu.make_async_copy(w2_hbm_ref, w2_vmem, dma_sem)
    w2_cp.start()

    # ---- in-kernel stack of the two batches (replaces the wrapper concat) --
    x = jnp.concatenate([xin_ref[...], xaux_ref[...]], axis=0)   # [16, 256] f32
    x = x.astype(jnp.bfloat16)                                   # MXU operand

    b1 = b_ref[0:1, :]                                           # [1, 128]
    b2 = b_ref[1:2, :]                                           # [1, 128]

    # ---- model: emb = relu(x @ W1 + b1)  (bf16 MXU, f32 accumulate) --------
    emb = jnp.dot(x, w1_ref[...], preferred_element_type=jnp.float32) + b1
    emb = jnp.maximum(emb, 0.0)                                  # [16, 128] f32
    # projection_head is Identity.

    # ---- Hopfield-energy OOD head -------------------------------------------
    # TODO(synk): ood_loss is abstract in the original Trainer; this is a
    # concrete Hopfield-energy logistic loss.  The memory includes each
    # query's own embedding (self-similarity = 1.0), as in previous versions.
    ss = jnp.sum(emb * emb, axis=-1, keepdims=True) + 1e-12      # [16, 1]
    inv_norm = jax.lax.rsqrt(ss)
    mem = (emb * inv_norm).astype(jnp.bfloat16)                  # unit rows, bf16
    # single self-Gram matmul (no concat, one MXU dispatch)
    sim = jax.lax.dot_general(mem, mem, (((1,), (1,)), ((), ())),
                              preferred_element_type=jnp.float32)  # [16, 16]
    s = BETA * sim
    m = jnp.max(s, axis=-1, keepdims=True)
    lse_s = m + jnp.log(jnp.sum(jnp.exp(s - m), axis=-1, keepdims=True))
    energy = -(1.0 / BETA) * lse_s                               # [16, 1]
    e_in, e_out = energy[:B_IN], energy[B_IN:]

    def softplus(z):
        return jnp.maximum(z, 0.0) + jnp.log(1.0 + jnp.exp(-jnp.abs(z)))

    ood_loss = (jnp.sum(softplus(e_in), keepdims=True) * (1.0 / B_IN)
                + jnp.sum(softplus(-e_out), keepdims=True) * (1.0 / B_AUX))
    e_in_mean = jnp.sum(e_in, keepdims=True) * (1.0 / B_IN)
    e_out_mean = jnp.sum(e_out, keepdims=True) * (1.0 / B_AUX)

    # ---- classifier (lane-padded to 128; padded cols of W2/b2 are zero) ----
    w2_cp.wait()                                                 # w2 now in VMEM
    logits = jnp.dot(emb.astype(jnp.bfloat16), w2_vmem[...],
                     preferred_element_type=jnp.float32) + b2    # [16, 128]

    lane = jax.lax.broadcasted_iota(jnp.int32, (B_TOTAL, LANES), 1)
    class_mask = lane < NUM_CLASSES
    logits_m = jnp.where(class_mask, logits, jnp.float32(-1e30))

    # NaN detection over the real class lanes (original: assert on isnan).
    # TODO(synk): runtime asserts have no in-kernel equivalent; the count is
    # emitted as a stat instead of raising.
    nan_cnt = jnp.sum(jnp.where(class_mask & (logits != logits), 1.0, 0.0),
                      keepdims=True)                             # (1, 1)

    # ---- cross-entropy + accuracy on in-distribution rows -------------------
    logits_in = logits_m[:B_IN]                                  # [B_IN, LANES]
    lane_in = lane[:B_IN]
    y_col = y_ref[...]                                           # [B_IN, 1] int32
    onehot = (lane_in == y_col).astype(jnp.float32)              # pad lanes never match

    max_l = jnp.max(logits_in, axis=-1, keepdims=True)           # [B_IN, 1]
    lse = max_l + jnp.log(jnp.sum(jnp.exp(logits_in - max_l), axis=-1,
                                  keepdims=True))
    logit_y = jnp.sum(logits_in * onehot, axis=-1, keepdims=True)
    in_loss = jnp.sum(lse - logit_y, keepdims=True) * (1.0 / B_IN)   # (1, 1)

    # argmax with lowest-index tie-break (matches torch.argmax semantics)
    lane_f = lane_in.astype(jnp.float32)
    pred = jnp.min(jnp.where(logits_in == max_l, lane_f, jnp.float32(LANES)),
                   axis=-1, keepdims=True)                       # [B_IN, 1]
    correct = (pred == y_col.astype(jnp.float32)).astype(jnp.float32)
    acc = jnp.sum(correct, keepdims=True) * (1.0 / B_IN)         # (1, 1)

    loss = in_loss + OOD_WEIGHT * ood_loss

    # ---- packed, lane-dense output (two unmasked full-tile stores) ----------
    out_ref[:B_IN, :] = logits[:B_IN]          # padded lanes are exactly zero
    lane_s = jax.lax.broadcasted_iota(jnp.int32, (STATS_ROWS, LANES), 1)
    stats = jnp.where(lane_s == S_IN_LOSS, in_loss, 0.0)
    stats = jnp.where(lane_s == S_ACC, acc, stats)
    stats = jnp.where(lane_s == S_OOD_LOSS, ood_loss, stats)
    stats = jnp.where(lane_s == S_LOSS, loss, stats)
    stats = jnp.where(lane_s == S_E_IN, e_in_mean, stats)
    stats = jnp.where(lane_s == S_E_OUT, e_out_mean, stats)
    stats = jnp.where(lane_s == S_NAN, nan_cnt, stats)
    out_ref[B_IN:, :] = stats


def _call_fused_kernel(y_col, x_in, x_aux, w1, biases, w2p):
    flops = (2 * B_TOTAL * D_IN * HIDDEN            # x @ W1
             + 2 * B_TOTAL * HIDDEN * LANES         # classifier
             + 2 * B_TOTAL * HIDDEN * B_TOTAL)      # Hopfield self-Gram
    bytes_accessed = (y_col.size * 4 + x_in.size * 4 + x_aux.size * 4
                      + w1.size * 2 + biases.size * 4 + w2p.size * 2
                      + OUT_ROWS * LANES * 4)
    return pl.pallas_call(
        trainer_fwd_kernel,
        out_shape=jax.ShapeDtypeStruct((OUT_ROWS, LANES), jnp.float32),
        in_specs=[
            pl.BlockSpec(memory_space=pltpu.MemorySpace.VMEM),   # y  [B_IN,1] i32
            pl.BlockSpec(memory_space=pltpu.MemorySpace.VMEM),   # x_in  f32
            pl.BlockSpec(memory_space=pltpu.MemorySpace.VMEM),   # x_aux f32
            pl.BlockSpec(memory_space=pltpu.MemorySpace.VMEM),   # w1 (bf16)
            pl.BlockSpec(memory_space=pltpu.MemorySpace.VMEM),   # biases [2,128] f32
            pl.BlockSpec(memory_space=pl.ANY),                   # w2p (HBM, manual DMA)
        ],
        out_specs=pl.BlockSpec(memory_space=pltpu.MemorySpace.VMEM),
        scratch_shapes=[
            pltpu.VMEM((HIDDEN, LANES), jnp.bfloat16),           # w2 landing buffer
            pltpu.SemaphoreType.DMA,                             # its completion sem
        ],
        cost_estimate=pl.CostEstimate(flops=flops, transcendentals=1500,
                                      bytes_accessed=bytes_accessed),
    )(y_col, x_in, x_aux, w1, biases, w2p)


@jax.jit
def _forward_impl(x, y, x_aux, w1, biases, w2p):
    # Zero-copy prep: reshapes only (no concat, no standalone convert launch).
    x_in = x.reshape(B_IN, D_IN).astype(jnp.float32)
    x_a = x_aux.reshape(B_AUX, D_IN).astype(jnp.float32)
    y_col = y.astype(jnp.int32).reshape(B_IN, 1)

    out = _call_fused_kernel(y_col, x_in, x_a, w1, biases, w2p)

    logits_in = out[:B_IN, :NUM_CLASSES]
    stats = out[B_IN]
    in_loss = stats[S_IN_LOSS]
    acc = stats[S_ACC]
    ood_loss = stats[S_OOD_LOSS]
    loss = stats[S_LOSS]

    info_dict = {
        'classifier/acc': acc,
        'classifier/in_loss': in_loss,
        'classifier/in_logits': logits_in,
        'general/loss': loss,
        'out/ood_loss': ood_loss,
        'energies/energy_in': stats[S_E_IN],
        'energies/energy_out': stats[S_E_OUT],
        'debug/nan_count': stats[S_NAN],
    }
    return loss, info_dict


class PallasTrainer:
    """JAX/Pallas re-implementation of Trainer.forward (use_ood=True path)."""

    def __init__(self, key, use_ood=True):
        # TODO(synk): use_ood=False path and the optimizer / .step() backward
        # pass are training-loop machinery, not part of the forward kernel.
        assert use_ood, "only the use_ood=True path is implemented"
        k1, k2, k3, k4 = jax.random.split(key, 4)
        w1 = (jax.random.normal(k1, (D_IN, HIDDEN), jnp.float32)
              / jnp.sqrt(jnp.float32(D_IN)))
        w2 = (jax.random.normal(k2, (HIDDEN, NUM_CLASSES), jnp.float32)
              / jnp.sqrt(jnp.float32(HIDDEN)))
        b1 = 0.01 * jax.random.normal(k3, (HIDDEN,), jnp.float32)
        b2 = 0.01 * jax.random.normal(k4, (NUM_CLASSES,), jnp.float32)
        # bf16 weights for the MXU; classifier lane-padded to 128 with zeros so
        # the kernel's output stays lane-dense and padded logits are exactly 0.
        self.w1 = w1.astype(jnp.bfloat16)
        # merged bias slab: row 0 = b1, row 1 = b2 (lane-padded with zeros).
        self.biases = (jnp.zeros((2, LANES), jnp.float32)
                       .at[0, :HIDDEN].set(b1)
                       .at[1, :NUM_CLASSES].set(b2))
        # Classifier weights stay in HBM at call time (pl.ANY); the kernel
        # overlaps their DMA with the first matmul.
        self.w2p = jnp.zeros((HIDDEN, LANES), jnp.bfloat16).at[
            :, :NUM_CLASSES].set(w2.astype(jnp.bfloat16))
        self.ood_weight = OOD_WEIGHT   # baked into the kernel as a constant
        self.beta = BETA               # baked into the kernel as a constant
        self.use_ood = use_ood

    def forward(self, x, y, x_aux):
        assert x_aux is not None
        assert x.shape[0] == B_IN and x_aux.shape[0] == B_AUX
        return _forward_impl(x, y, x_aux, self.w1, self.biases, self.w2p)


if __name__ == "__main__":
    key = jax.random.PRNGKey(0)
    k_param, k_x, k_aux, k_y = jax.random.split(key, 4)

    trainer = PallasTrainer(k_param)

    x = jax.random.normal(k_x, (B_IN, C, H, W), jnp.float32)      # NCHW
    x_aux = jax.random.normal(k_aux, (B_AUX, C, H, W), jnp.float32)
    y = jax.random.randint(k_y, (B_IN,), 0, NUM_CLASSES, jnp.int32)

    loss, info = trainer.forward(x, y, x_aux)
    loss = jax.block_until_ready(loss)
    jax.block_until_ready(info['classifier/in_logits'])

    assert jnp.isfinite(loss), "loss is not finite"
    assert info['classifier/in_logits'].shape == (B_IN, NUM_CLASSES)
    print("KERNEL_OK")
</pallas_src>

<mosaic_0001>
module attributes {stable_mosaic.version = 11 : i64} {
  func.func @trainer_fwd_kernel(%arg0: memref<8x1xi32, #tpu.memory_space<vmem>>, %arg1: memref<8x256xf32, #tpu.memory_space<vmem>>, %arg2: memref<8x256xf32, #tpu.memory_space<vmem>>, %arg3: memref<256x128xbf16, #tpu.memory_space<vmem>>, %arg4: memref<2x128xf32, #tpu.memory_space<vmem>>, %arg5: memref<128x128xbf16, #tpu.memory_space<any>>, %arg6: memref<16x128xf32, #tpu.memory_space<vmem>>, %arg7: memref<128x128xbf16, #tpu.memory_space<vmem>>, %arg8: memref<!tpu.dma_semaphore, #tpu.memory_space<semaphore_mem>>) attributes {dimension_semantics = [], scalar_prefetch = 0 : i64, scratch_operands = 2 : i64, tpu.core_type = #tpu.core_type<tc>} {
    tpu.enqueue_dma source(%arg5 : memref<128x128xbf16, #tpu.memory_space<any>>) target(%arg7 : memref<128x128xbf16, #tpu.memory_space<vmem>>) target_semaphore(%arg8 : memref<!tpu.dma_semaphore, #tpu.memory_space<semaphore_mem>>)
    %c0 = arith.constant 0 : index
    %c0_0 = arith.constant 0 : index
    %0 = vector.load %arg1[%c0, %c0_0] : memref<8x256xf32, #tpu.memory_space<vmem>>, vector<8x256xf32>
    %c0_1 = arith.constant 0 : index
    %c0_2 = arith.constant 0 : index
    %1 = vector.load %arg2[%c0_1, %c0_2] : memref<8x256xf32, #tpu.memory_space<vmem>>, vector<8x256xf32>
    %2 = tpu.concatenate %0, %1 in 0 : vector<8x256xf32>, vector<8x256xf32> -> vector<16x256xf32>
    %3 = arith.truncf %2 : vector<16x256xf32> to vector<16x256xbf16>
    %c0_3 = arith.constant 0 : index
    %c0_4 = arith.constant 0 : index
    %4 = vector.load %arg4[%c0_3, %c0_4] : memref<2x128xf32, #tpu.memory_space<vmem>>, vector<1x128xf32>
    %c1 = arith.constant 1 : index
    %c0_5 = arith.constant 0 : index
    %5 = vector.load %arg4[%c1, %c0_5] : memref<2x128xf32, #tpu.memory_space<vmem>>, vector<1x128xf32>
    %c0_6 = arith.constant 0 : index
    %c0_7 = arith.constant 0 : index
    %6 = vector.load %arg3[%c0_6, %c0_7] : memref<256x128xbf16, #tpu.memory_space<vmem>>, vector<256x128xbf16>
    %cst = arith.constant dense<0.000000e+00> : vector<16x128xf32>
    %7 = tpu.matmul %3, %6, %cst {dimension_numbers = #tpu.dot_dimension_numbers<[1], [0], [0], [1], [0, 0, 1, 1], [], []>} : vector<16x256xbf16>, vector<256x128xbf16>, vector<16x128xf32> -> vector<16x128xf32>
    %8 = vector.broadcast %4 : vector<1x128xf32> to vector<16x128xf32>
    %9 = arith.addf %7, %8 : vector<16x128xf32>
    %cst_8 = arith.constant 0.000000e+00 : f32
    %10 = vector.broadcast %cst_8 : f32 to vector<16x128xf32>
    %11 = arith.maximumf %9, %10 : vector<16x128xf32>
    %12 = arith.mulf %11, %11 : vector<16x128xf32>
    %cst_9 = arith.constant dense<0.000000e+00> : vector<16xf32>
    %13 = vector.multi_reduction <add>, %12, %cst_9 [1] : vector<16x128xf32> to vector<16xf32>
    %14 = vector.shape_cast %13 : vector<16xf32> to vector<16x1xf32>
    %cst_10 = arith.constant 9.99999996E-13 : f32
    %15 = vector.broadcast %cst_10 : f32 to vector<16x1xf32>
    %16 = arith.addf %14, %15 : vector<16x1xf32>
    %17 = math.rsqrt %16 : vector<16x1xf32>
    %18 = vector.broadcast %17 : vector<16x1xf32> to vector<16x128xf32>
    %19 = arith.mulf %11, %18 : vector<16x128xf32>
    %20 = arith.truncf %19 : vector<16x128xf32> to vector<16x128xbf16>
    %cst_11 = arith.constant dense<0.000000e+00> : vector<16x16xf32>
    %21 = tpu.matmul %20, %20, %cst_11 {dimension_numbers = #tpu.dot_dimension_numbers<[1], [1], [0], [0], [0, 0, 1, 0], [], []>} : vector<16x128xbf16>, vector<16x128xbf16>, vector<16x16xf32> -> vector<16x16xf32>
    %cst_12 = arith.constant 2.000000e+00 : f32
    %22 = vector.broadcast %cst_12 : f32 to vector<16x16xf32>
    %23 = arith.mulf %22, %21 : vector<16x16xf32>
    %cst_13 = arith.constant dense<0xFF800000> : vector<16xf32>
    %24 = vector.multi_reduction <maximumf>, %23, %cst_13 [1] : vector<16x16xf32> to vector<16xf32>
    %25 = vector.shape_cast %24 : vector<16xf32> to vector<16x1xf32>
    %26 = vector.broadcast %25 : vector<16x1xf32> to vector<16x16xf32>
    %27 = arith.subf %23, %26 : vector<16x16xf32>
    %28 = math.exp %27 : vector<16x16xf32>
    %cst_14 = arith.constant dense<0.000000e+00> : vector<16xf32>
    %29 = vector.multi_reduction <add>, %28, %cst_14 [1] : vector<16x16xf32> to vector<16xf32>
    %30 = vector.shape_cast %29 : vector<16xf32> to vector<16x1xf32>
    %31 = math.log %30 : vector<16x1xf32>
    %32 = arith.addf %25, %31 : vector<16x1xf32>
    %cst_15 = arith.constant -5.000000e-01 : f32
    %33 = vector.broadcast %cst_15 : f32 to vector<16x1xf32>
    %34 = arith.mulf %33, %32 : vector<16x1xf32>
    %35 = vector.extract_strided_slice %34 {offsets = [0, 0], sizes = [8, 1], strides = [1, 1]} : vector<16x1xf32> to vector<8x1xf32>
    %36 = vector.extract_strided_slice %34 {offsets = [8, 0], sizes = [8, 1], strides = [1, 1]} : vector<16x1xf32> to vector<8x1xf32>
    %cst_16 = arith.constant 0.000000e+00 : f32
    %37 = vector.broadcast %cst_16 : f32 to vector<8x1xf32>
    %38 = arith.maximumf %35, %37 : vector<8x1xf32>
    %39 = math.absf %35 : vector<8x1xf32>
    %cst_17 = arith.constant 0.000000e+00 : f32
    %40 = vector.broadcast %cst_17 : f32 to vector<8x1xf32>
    %41 = arith.subf %40, %39 : vector<8x1xf32>
    %42 = math.exp %41 : vector<8x1xf32>
    %cst_18 = arith.constant 1.000000e+00 : f32
    %43 = vector.broadcast %cst_18 : f32 to vector<8x1xf32>
    %44 = arith.addf %43, %42 : vector<8x1xf32>
    %45 = math.log %44 : vector<8x1xf32>
    %46 = arith.addf %38, %45 : vector<8x1xf32>
    %47 = vector.shape_cast %46 : vector<8x1xf32> to vector<1x8x1xf32>
    %cst_19 = arith.constant dense<0.000000e+00> : vector<1xf32>
    %48 = vector.multi_reduction <add>, %47, %cst_19 [1, 2] : vector<1x8x1xf32> to vector<1xf32>
    %49 = vector.shape_cast %48 : vector<1xf32> to vector<1x1x1xf32>
    %50 = vector.extract %49[0, 0, 0] : f32 from vector<1x1x1xf32>
    %51 = vector.broadcast %50 : f32 to vector<1x1xf32>
    %cst_20 = arith.constant 1.250000e-01 : f32
    %52 = vector.broadcast %cst_20 : f32 to vector<1x1xf32>
    %53 = arith.mulf %51, %52 : vector<1x1xf32>
    %cst_21 = arith.constant 0.000000e+00 : f32
    %54 = vector.broadcast %cst_21 : f32 to vector<8x1xf32>
    %55 = arith.subf %54, %36 : vector<8x1xf32>
    %cst_22 = arith.constant 0.000000e+00 : f32
    %56 = vector.broadcast %cst_22 : f32 to vector<8x1xf32>
    %57 = arith.maximumf %55, %56 : vector<8x1xf32>
    %58 = math.absf %55 : vector<8x1xf32>
    %cst_23 = arith.constant 0.000000e+00 : f32
    %59 = vector.broadcast %cst_23 : f32 to vector<8x1xf32>
    %60 = arith.subf %59, %58 : vector<8x1xf32>
    %61 = math.exp %60 : vector<8x1xf32>
    %cst_24 = arith.constant 1.000000e+00 : f32
    %62 = vector.broadcast %cst_24 : f32 to vector<8x1xf32>
    %63 = arith.addf %62, %61 : vector<8x1xf32>
    %64 = math.log %63 : vector<8x1xf32>
    %65 = arith.addf %57, %64 : vector<8x1xf32>
    %66 = vector.shape_cast %65 : vector<8x1xf32> to vector<1x8x1xf32>
    %cst_25 = arith.constant dense<0.000000e+00> : vector<1xf32>
    %67 = vector.multi_reduction <add>, %66, %cst_25 [1, 2] : vector<1x8x1xf32> to vector<1xf32>
    %68 = vector.shape_cast %67 : vector<1xf32> to vector<1x1x1xf32>
    %69 = vector.extract %68[0, 0, 0] : f32 from vector<1x1x1xf32>
    %70 = vector.broadcast %69 : f32 to vector<1x1xf32>
    %cst_26 = arith.constant 1.250000e-01 : f32
    %71 = vector.broadcast %cst_26 : f32 to vector<1x1xf32>
    %72 = arith.mulf %70, %71 : vector<1x1xf32>
    %73 = arith.addf %53, %72 : vector<1x1xf32>
    %74 = vector.shape_cast %35 : vector<8x1xf32> to vector<1x8x1xf32>
    %cst_27 = arith.constant dense<0.000000e+00> : vector<1xf32>
    %75 = vector.multi_reduction <add>, %74, %cst_27 [1, 2] : vector<1x8x1xf32> to vector<1xf32>
    %76 = vector.shape_cast %75 : vector<1xf32> to vector<1x1x1xf32>
    %77 = vector.extract %76[0, 0, 0] : f32 from vector<1x1x1xf32>
    %78 = vector.broadcast %77 : f32 to vector<1x1xf32>
    %cst_28 = arith.constant 1.250000e-01 : f32
    %79 = vector.broadcast %cst_28 : f32 to vector<1x1xf32>
    %80 = arith.mulf %78, %79 : vector<1x1xf32>
    %81 = vector.shape_cast %36 : vector<8x1xf32> to vector<1x8x1xf32>
    %cst_29 = arith.constant dense<0.000000e+00> : vector<1xf32>
    %82 = vector.multi_reduction <add>, %81, %cst_29 [1, 2] : vector<1x8x1xf32> to vector<1xf32>
    %83 = vector.shape_cast %82 : vector<1xf32> to vector<1x1x1xf32>
    %84 = vector.extract %83[0, 0, 0] : f32 from vector<1x1x1xf32>
    %85 = vector.broadcast %84 : f32 to vector<1x1xf32>
    %cst_30 = arith.constant 1.250000e-01 : f32
    %86 = vector.broadcast %cst_30 : f32 to vector<1x1xf32>
    %87 = arith.mulf %85, %86 : vector<1x1xf32>
    tpu.wait_dma2 semaphore(%arg8 : memref<!tpu.dma_semaphore, #tpu.memory_space<semaphore_mem>>) src(%arg5 : memref<128x128xbf16, #tpu.memory_space<any>>) dst(%arg7 : memref<128x128xbf16, #tpu.memory_space<vmem>>)
    %88 = arith.truncf %11 : vector<16x128xf32> to vector<16x128xbf16>
    %c0_31 = arith.constant 0 : index
    %c0_32 = arith.constant 0 : index
    %89 = vector.load %arg7[%c0_31, %c0_32] : memref<128x128xbf16, #tpu.memory_space<vmem>>, vector<128x128xbf16>
    %cst_33 = arith.constant dense<0.000000e+00> : vector<16x128xf32>
    %90 = tpu.matmul %88, %89, %cst_33 {dimension_numbers = #tpu.dot_dimension_numbers<[1], [0], [0], [1], [0, 0, 1, 1], [], []>} : vector<16x128xbf16>, vector<128x128xbf16>, vector<16x128xf32> -> vector<16x128xf32>
    %91 = vector.broadcast %5 : vector<1x128xf32> to vector<16x128xf32>
    %92 = arith.addf %90, %91 : vector<16x128xf32>
    %93 = tpu.iota {dimensions = array<i32: 1>} : vector<16x128xi32>
    %c10_i32 = arith.constant 10 : i32
    %94 = vector.broadcast %c10_i32 : i32 to vector<16x128xi32>
    %95 = arith.cmpi slt, %93, %94 : vector<16x128xi32>
    %cst_34 = arith.constant -1.000000e+30 : f32
    %96 = vector.broadcast %cst_34 : f32 to vector<16x128xf32>
    %97 = arith.select %95, %92, %96 : vector<16x128xi1>, vector<16x128xf32>
    %98 = arith.cmpf one, %92, %92 : vector<16x128xf32>
    %99 = arith.andi %95, %98 : vector<16x128xi1>
    %cst_35 = arith.constant 1.000000e+00 : f32
    %cst_36 = arith.constant 0.000000e+00 : f32
    %100 = vector.broadcast %cst_35 : f32 to vector<16x128xf32>
    %101 = vector.broadcast %cst_36 : f32 to vector<16x128xf32>
    %102 = arith.select %99, %100, %101 : vector<16x128xi1>, vector<16x128xf32>
    %103 = vector.shape_cast %102 : vector<16x128xf32> to vector<1x16x128xf32>
    %cst_37 = arith.constant dense<0.000000e+00> : vector<1xf32>
    %104 = vector.multi_reduction <add>, %103, %cst_37 [1, 2] : vector<1x16x128xf32> to vector<1xf32>
    %105 = vector.shape_cast %104 : vector<1xf32> to vector<1x1x1xf32>
    %106 = vector.extract %105[0, 0, 0] : f32 from vector<1x1x1xf32>
    %107 = vector.broadcast %106 : f32 to vector<1x1xf32>
    %108 = vector.extract_strided_slice %97 {offsets = [0, 0], sizes = [8, 128], strides = [1, 1]} : vector<16x128xf32> to vector<8x128xf32>
    %109 = vector.extract_strided_slice %93 {offsets = [0, 0], sizes = [8, 128], strides = [1, 1]} : vector<16x128xi32> to vector<8x128xi32>
    %c0_38 = arith.constant 0 : index
    %c0_39 = arith.constant 0 : index
    %110 = vector.load %arg0[%c0_38, %c0_39] : memref<8x1xi32, #tpu.memory_space<vmem>>, vector<8x1xi32>
    %111 = vector.broadcast %110 : vector<8x1xi32> to vector<8x128xi32>
    %112 = arith.cmpi eq, %109, %111 : vector<8x128xi32>
    %113 = arith.extui %112 : vector<8x128xi1> to vector<8x128xi32>
    %114 = arith.sitofp %113 : vector<8x128xi32> to vector<8x128xf32>
    %cst_40 = arith.constant dense<0xFF800000> : vector<8xf32>
    %115 = vector.multi_reduction <maximumf>, %108, %cst_40 [1] : vector<8x128xf32> to vector<8xf32>
    %116 = vector.shape_cast %115 : vector<8xf32> to vector<8x1xf32>
    %117 = vector.broadcast %116 : vector<8x1xf32> to vector<8x128xf32>
    %118 = arith.subf %108, %117 : vector<8x128xf32>
    %119 = math.exp %118 : vector<8x128xf32>
    %cst_41 = arith.constant dense<0.000000e+00> : vector<8xf32>
    %120 = vector.multi_reduction <add>, %119, %cst_41 [1] : vector<8x128xf32> to vector<8xf32>
    %121 = vector.shape_cast %120 : vector<8xf32> to vector<8x1xf32>
    %122 = math.log %121 : vector<8x1xf32>
    %123 = arith.addf %116, %122 : vector<8x1xf32>
    %124 = arith.mulf %108, %114 : vector<8x128xf32>
    %cst_42 = arith.constant dense<0.000000e+00> : vector<8xf32>
    %125 = vector.multi_reduction <add>, %124, %cst_42 [1] : vector<8x128xf32> to vector<8xf32>
    %126 = vector.shape_cast %125 : vector<8xf32> to vector<8x1xf32>
    %127 = arith.subf %123, %126 : vector<8x1xf32>
    %128 = vector.shape_cast %127 : vector<8x1xf32> to vector<1x8x1xf32>
    %cst_43 = arith.constant dense<0.000000e+00> : vector<1xf32>
    %129 = vector.multi_reduction <add>, %128, %cst_43 [1, 2] : vector<1x8x1xf32> to vector<1xf32>
    %130 = vector.shape_cast %129 : vector<1xf32> to vector<1x1x1xf32>
    %131 = vector.extract %130[0, 0, 0] : f32 from vector<1x1x1xf32>
    %132 = vector.broadcast %131 : f32 to vector<1x1xf32>
    %cst_44 = arith.constant 1.250000e-01 : f32
    %133 = vector.broadcast %cst_44 : f32 to vector<1x1xf32>
    %134 = arith.mulf %132, %133 : vector<1x1xf32>
    %135 = arith.sitofp %109 : vector<8x128xi32> to vector<8x128xf32>
    %136 = vector.broadcast %116 : vector<8x1xf32> to vector<8x128xf32>
    %137 = arith.cmpf oeq, %108, %136 : vector<8x128xf32>
    %cst_45 = arith.constant 1.280000e+02 : f32
    %138 = vector.broadcast %cst_45 : f32 to vector<8x128xf32>
    %139 = arith.select %137, %135, %138 : vector<8x128xi1>, vector<8x128xf32>
    %cst_46 = arith.constant dense<0x7F800000> : vector<8xf32>
    %140 = vector.multi_reduction <minimumf>, %139, %cst_46 [1] : vector<8x128xf32> to vector<8xf32>
    %141 = vector.shape_cast %140 : vector<8xf32> to vector<8x1xf32>
    %142 = arith.sitofp %110 : vector<8x1xi32> to vector<8x1xf32>
    %143 = arith.cmpf oeq, %141, %142 : vector<8x1xf32>
    %144 = arith.extui %143 : vector<8x1xi1> to vector<8x1xi32>
    %145 = arith.sitofp %144 : vector<8x1xi32> to vector<8x1xf32>
    %146 = vector.shape_cast %145 : vector<8x1xf32> to vector<1x8x1xf32>
    %cst_47 = arith.constant dense<0.000000e+00> : vector<1xf32>
    %147 = vector.multi_reduction <add>, %146, %cst_47 [1, 2] : vector<1x8x1xf32> to vector<1xf32>
    %148 = vector.shape_cast %147 : vector<1xf32> to vector<1x1x1xf32>
    %149 = vector.extract %148[0, 0, 0] : f32 from vector<1x1x1xf32>
    %150 = vector.broadcast %149 : f32 to vector<1x1xf32>
    %cst_48 = arith.constant 1.250000e-01 : f32
    %151 = vector.broadcast %cst_48 : f32 to vector<1x1xf32>
    %152 = arith.mulf %150, %151 : vector<1x1xf32>
    %cst_49 = arith.constant 5.000000e-01 : f32
    %153 = vector.broadcast %cst_49 : f32 to vector<1x1xf32>
    %154 = arith.mulf %153, %73 : vector<1x1xf32>
    %155 = arith.addf %134, %154 : vector<1x1xf32>
    %156 = vector.extract_strided_slice %92 {offsets = [0, 0], sizes = [8, 128], strides = [1, 1]} : vector<16x128xf32> to vector<8x128xf32>
    %c0_50 = arith.constant 0 : index
    %c0_51 = arith.constant 0 : index
    %157 = vector.load %arg6[%c0_50, %c0_51] : memref<16x128xf32, #tpu.memory_space<vmem>>, vector<8x128xf32>
    tpu.vector_store %arg6[%c0_50, %c0_51], %156 {strides = array<i32>} : memref<16x128xf32, #tpu.memory_space<vmem>>, vector<8x128xf32>,
    %158 = tpu.iota {dimensions = array<i32: 1>} : vector<8x128xi32>
    %c0_i32 = arith.constant 0 : i32
    %159 = vector.broadcast %c0_i32 : i32 to vector<8x128xi32>
    %160 = arith.cmpi eq, %158, %159 : vector<8x128xi32>
    %cst_52 = arith.constant 0.000000e+00 : f32
    %161 = vector.shape_cast %134 : vector<1x1xf32> to vector<1x1xf32>
    %162 = vector.broadcast %161 : vector<1x1xf32> to vector<8x128xf32>
    %163 = vector.broadcast %cst_52 : f32 to vector<8x128xf32>
    %164 = arith.select %160, %162, %163 : vector<8x128xi1>, vector<8x128xf32>
    %c1_i32 = arith.constant 1 : i32
    %165 = vector.broadcast %c1_i32 : i32 to vector<8x128xi32>
    %166 = arith.cmpi eq, %158, %165 : vector<8x128xi32>
    %167 = vector.shape_cast %152 : vector<1x1xf32> to vector<1x1xf32>
    %168 = vector.broadcast %167 : vector<1x1xf32> to vector<8x128xf32>
    %169 = arith.select %166, %168, %164 : vector<8x128xi1>, vector<8x128xf32>
    %c2_i32 = arith.constant 2 : i32
    %170 = vector.broadcast %c2_i32 : i32 to vector<8x128xi32>
    %171 = arith.cmpi eq, %158, %170 : vector<8x128xi32>
    %172 = vector.shape_cast %73 : vector<1x1xf32> to vector<1x1xf32>
    %173 = vector.broadcast %172 : vector<1x1xf32> to vector<8x128xf32>
    %174 = arith.select %171, %173, %169 : vector<8x128xi1>, vector<8x128xf32>
    %c3_i32 = arith.constant 3 : i32
    %175 = vector.broadcast %c3_i32 : i32 to vector<8x128xi32>
    %176 = arith.cmpi eq, %158, %175 : vector<8x128xi32>
    %177 = vector.shape_cast %155 : vector<1x1xf32> to vector<1x1xf32>
    %178 = vector.broadcast %177 : vector<1x1xf32> to vector<8x128xf32>
    %179 = arith.select %176, %178, %174 : vector<8x128xi1>, vector<8x128xf32>
    %c4_i32 = arith.constant 4 : i32
    %180 = vector.broadcast %c4_i32 : i32 to vector<8x128xi32>
    %181 = arith.cmpi eq, %158, %180 : vector<8x128xi32>
    %182 = vector.shape_cast %80 : vector<1x1xf32> to vector<1x1xf32>
    %183 = vector.broadcast %182 : vector<1x1xf32> to vector<8x128xf32>
    %184 = arith.select %181, %183, %179 : vector<8x128xi1>, vector<8x128xf32>
    %c5_i32 = arith.constant 5 : i32
    %185 = vector.broadcast %c5_i32 : i32 to vector<8x128xi32>
    %186 = arith.cmpi eq, %158, %185 : vector<8x128xi32>
    %187 = vector.shape_cast %87 : vector<1x1xf32> to vector<1x1xf32>
    %188 = vector.broadcast %187 : vector<1x1xf32> to vector<8x128xf32>
    %189 = arith.select %186, %188, %184 : vector<8x128xi1>, vector<8x128xf32>
    %c6_i32 = arith.constant 6 : i32
    %190 = vector.broadcast %c6_i32 : i32 to vector<8x128xi32>
    %191 = arith.cmpi eq, %158, %190 : vector<8x128xi32>
    %192 = vector.shape_cast %107 : vector<1x1xf32> to vector<1x1xf32>
    %193 = vector.broadcast %192 : vector<1x1xf32> to vector<8x128xf32>
    %194 = arith.select %191, %193, %189 : vector<8x128xi1>, vector<8x128xf32>
    %c8 = arith.constant 8 : index
    %c0_53 = arith.constant 0 : index
    %195 = vector.load %arg6[%c8, %c0_53] : memref<16x128xf32, #tpu.memory_space<vmem>>, vector<8x128xf32>
    tpu.vector_store %arg6[%c8, %c0_53], %194 {strides = array<i32>} : memref<16x128xf32, #tpu.memory_space<vmem>>, vector<8x128xf32>,
    return
  }
}

</mosaic_0001>

<bundles_post_ra>
// kernel: _forward_impl.1
= control target key start
LH: loop header
LB: loop body
LE: loop exit
PB: predicated region body
PF: predicated region fallthrough
CT: control target
= control target key end

     0   :  { %s997_s0 = inlined_call_operand.vmem [shape: s32[8,1], index: 0, kind: input, shape index: {}]   ;;  %s998_s1 = inlined_call_operand.vmem [shape: f32[8,256], index: 1, kind: input, shape index: {}]   ;;  %s999_s2 = inlined_call_operand.vmem [shape: f32[8,256], index: 2, kind: input, shape index: {}]   ;;  %s1000_s3 = inlined_call_operand.vmem [shape: bf16[256,128], index: 3, kind: input, shape index: {}]   ;;  %s1001_s4 = inlined_call_operand.vmem [shape: f32[2,128], index: 4, kind: input, shape index: {}]   ;;  %s1002_s5 = inlined_call_operand.vmem [shape: bf16[128,128], index: 5, kind: input, shape index: {}]   ;;  %s1003_s6 = inlined_call_operand.vmem [shape: f32[16,128], index: 6, kind: output, shape index: {}]  }
   0x1   :  { %v55_v0 = vld [vmem:[%s1002_s5] sm:$0xff]  ;;  %v57_v1 = vld [vmem:[%s1002_s5 + $0x8] sm:$0xff]  ;;  %v59_v2 = vld [vmem:[%s1002_s5 + $0x10] sm:$0xff] }
   0x2   :  { %56 = vst [vmem:[#allocation2] sm:$0xff] %v55_v0  ;;  %58 = vst [vmem:[#allocation2 + $0x8] sm:$0xff] %v57_v1  ;;  %v61_v3 = vld [vmem:[%s1002_s5 + $0x18] sm:$0xff]  ;;  %v63_v4 = vld [vmem:[%s1002_s5 + $0x20] sm:$0xff] }
   0x3   :  { %60 = vst [vmem:[#allocation2 + $0x10] sm:$0xff] %v59_v2  ;;  %v65_v5 = vld [vmem:[%s1002_s5 + $0x28] sm:$0xff]  ;;  %62 = vst [vmem:[#allocation2 + $0x18] sm:$0xff] %v61_v3  ;;  %v67_v6 = vld [vmem:[%s1002_s5 + $0x30] sm:$0xff] }
   0x4   :  { %64 = vst [vmem:[#allocation2 + $0x20] sm:$0xff] %v63_v4  ;;  %66 = vst [vmem:[#allocation2 + $0x28] sm:$0xff] %v65_v5  ;;  %v69_v7 = vld [vmem:[%s1002_s5 + $0x38] sm:$0xff] }
   0x5   :  { %68 = vst [vmem:[#allocation2 + $0x30] sm:$0xff] %v67_v6  ;;  %70 = vst [vmem:[#allocation2 + $0x38] sm:$0xff] %v69_v7 }
   0x6   :  { %78 = vsyncadd [#allocation3], 1024  ;;  %v860_v8 = vld [vmem:[%s1001_s4 + $0x1] ss:$0 sm:$0xff]  ;;  %v744_v9 = vld [vmem:[%s1000_s3 + $0x78] sm:$0xff]   ;;  %v795_v44 = vmov 0.0  }
   0x7   :  { %v745_v10 = vld [vmem:[%s1000_s3 + $0x38] sm:$0xff]   ;;  %668 = vmatprep.subr.bf16.mxu0 %v744_v9  ;;  %v746_v11 = vld [vmem:[%s1000_s3 + $0x70] sm:$0xff]   ;;  %v748_v13 = vld [vmem:[%s1000_s3 + $0x68] sm:$0xff]   ;;  %701 = vmatprep.subr.bf16.mxu1 %v795_v44  ;;  %vm796_vm0 = vmmov 0   ;;  %vm318_vm1 = vcmask 130048   ;;  %vm354_vm2 = vcmask 7168  }
   0x8   :  { %669 = vmatpush3.bf16.msra.mxu0 %v745_v10  ;;  %v747_v12 = vld [vmem:[%s1000_s3 + $0x30] sm:$0xff]   ;;  %v749_v14 = vld [vmem:[%s1000_s3 + $0x28] sm:$0xff]   ;;  %v750_v15 = vld [vmem:[%s1000_s3 + $0x60] sm:$0xff]   ;;  %703 = vmatprep.mubr.msk.bf16.mxu1 %vm796_vm0, %v795_v44 }
   0x9   :  { %670 = vmatprep.subr.bf16.mxu0 %v746_v11  ;;  %v751_v16 = vld [vmem:[%s1000_s3 + $0x20] sm:$0xff]   ;;  %v752_v17 = vld [vmem:[%s1000_s3 + $0x58] sm:$0xff]   ;;  %v80_v19 = vld [vmem:[%s998_s1 + $0x8] sm:$0xff] }
   0xa   :  { %v753_v18 = vld [vmem:[%s1000_s3 + $0x18] sm:$0xff]   ;;  %v754_v20 = vld [vmem:[%s1000_s3 + $0x50] sm:$0xff]   ;;  %v82_v21 = vld [vmem:[%s999_s2 + $0x8] sm:$0xff] }
   0xb   :  { %v84_v22 = vpack.c.bf16 %v82_v21, %v80_v19  ;;  %v755_v23 = vld [vmem:[%s1000_s3 + $0x10] sm:$0xff]   ;;  %v756_v24 = vld [vmem:[%s1000_s3 + $0x48] sm:$0xff]   ;;  %v758_v26 = vld [vmem:[%s1000_s3 + $0x40] sm:$0xff]  }
   0xc   :  { %671 = vmatpush3.bf16.msra.mxu0 %v747_v12  ;;  %v757_v25 = vld [vmem:[%s1000_s3 + $0x8] sm:$0xff]   ;;  %v759_v27 = vld [vmem:[%s1000_s3] sm:$0xff]  }
   0xd   :  { %672 = vmatprep.subr.bf16.mxu0 %v748_v13  ;;  %251 = vmatprep.mubr.bf16.mxu0 %v84_v22  ;;  %v79_v28 = vld [vmem:[%s998_s1] sm:$0xff] }
   0xe   :  { %v81_v29 = vld [vmem:[%s999_s2] sm:$0xff] }
   0xf   :  { %v83_v30 = vpack.c.bf16 %v81_v29, %v79_v28  ;;  %v639_v33 = vld [vmem:[%s1001_s4] ss:$0 sm:$0xff] }
  0x10   :  { %673 = vmatpush3.bf16.msra.mxu0 %v749_v14 }
  0x11   :  { %674 = vmatprep.subr.bf16.mxu0 %v750_v15 }
  0x14   :  { %675 = vmatpush3.bf16.msra.mxu0 %v751_v16 }
  0x15   :  { %676 = vmatprep.subr.bf16.mxu0 %v752_v17 }
  0x18   :  { %677 = vmatpush3.bf16.msra.mxu0 %v753_v18 }
  0x19   :  { %678 = vmatprep.subr.bf16.mxu0 %v754_v20 }
  0x1c   :  { %679 = vmatpush3.bf16.msra.mxu0 %v755_v23 }
  0x1d   :  { %680 = vmatprep.subr.bf16.mxu0 %v756_v24 }
  0x20   :  { %681 = vmatpush3.bf16.msra.mxu0 %v757_v25 }
  0x21   :  { %682 = vmatprep.subr.bf16.mxu0 %v758_v26 }
  0x24   :  { %683 = vmatpush3.bf16.msra.mxu0 %v759_v27 }
  0x27   :  { %252 = vmatmul.mubr.bf16.vlgmr.msra.gmra.mxu0 %v83_v30 }
  0xe7   :  { %v684_v31 = vpop.f32.mrf.mxu0 }
  0xe9   :  { %v685_v32 = vpop.f32.mrf.mxu0 }
  0xea   :  { %v686_v34 = vadd.f32 %v685_v32, %v684_v31 }
  0xeb   :  { %v687_v35 = vpop.f32.mrf.mxu0 }
  0xec   :  { %v254_v36 = vadd.f32 %v686_v34, %v639_v33 }
  0xed   :  { %v688_v37 = vpop.f32.mrf.mxu0 }
  0xee   :  { %v689_v38 = vadd.f32 %v688_v37, %v687_v35  ;;  %v925_v39 = vmax.f32 %v254_v36, 0.0 }
  0xf0   :  { %v257_v40 = vadd.f32 %v689_v38, %v639_v33  ;;  %v262_v41 = vmul.f32 %v925_v39, %v925_v39 }
  0xf2   :  { %v929_v42 = vmax.f32 %v257_v40, 0.0  ;;  %264 = vadd.xlane.f32.xlu0 %v262_v41 }
  0xf4   :  { %v263_v43 = vmul.f32 %v929_v42, %v929_v42 }
  0xf6   :  { %266 = vadd.xlane.f32.xlu0 %v263_v43 }
 0x17b   :  { %v265_v45 = vpop.xlane.xlu0 %264 }
 0x17c   :  { %v268_v46 = vadd.f32 1e-12, %v265_v45 }
 0x17e   :  { %760 = vrsqrt.f32 %v268_v46 }
 0x17f   :  { %v267_v47 = vpop.xlane.xlu0 %266 }
 0x180   :  { %v269_v48 = vadd.f32 1e-12, %v267_v47 }
 0x182   :  { %762 = vrsqrt.f32 %v269_v48 }
 0x18b   :  { %v761_v49 = vpop.eup %760 }
 0x18c   :  { %v272_v51 = vmul.f32 %v761_v49, %v925_v39 }
 0x18f   :  { %v763_v50 = vpop.eup %762 }
 0x190   :  { %v273_v52 = vmul.f32 %v763_v50, %v929_v42 }
 0x192   :  { %v274_v53 = vpack.c.bf16 %v273_v52, %v272_v51 }
 0x194   :  { %702 = vmatpush3.bf16.xpose.msra.mxu1 %v274_v53 }
 0x19b   :  { %704 = vmatmul.mubr.bf16.vlgmr.msra.gmra.mxu1 %v274_v53 }
 0x25b   :  { %v309_v54 = vpop.f32.mrf.mxu1 }
 0x25c   :  { %v316_v59 = vmul.f32 2.0, %v309_v54 }
 0x25d   :  { %v705_v55 = vpop.f32.mrf.mxu1 }
 0x25e   :  { %v319_v61 = vsel %vm318_vm1, %v316_v59, -inf }
 0x25f   :  { %v312_v56 = vpop.f32.mrf.mxu1 }
 0x260   :  { %v317_v57 = vmul.f32 2.0, %v312_v56 }
 0x261   :  { %v706_v58 = vpop.f32.mrf.mxu1 }
 0x262   :  { %v322_v60 = vsel %vm318_vm1, %v317_v57, -inf }
 0x263   :  { %323 = vmax.xlane.f32.xlu1 %v322_v60 }
 0x267   :  { %320 = vmax.xlane.f32.xlu1 %v319_v61 }
 0x2ec   :  { %v324_v62 = vpop.xlane.xlu1 %323 }
 0x2ed   :  { %v326_v63 = vsub.f32 %v317_v57, %v324_v62 }
 0x2ef   :  { %v329_v0 = vmul.f32 1.442695, %v326_v63 }
 0x2f0   :  { %v321_v1 = vpop.xlane.xlu1 %320 }
 0x2f1   :  { %764 = vpow2.f32 %v329_v0  ;;  %v325_v2 = vsub.f32 %v316_v59, %v321_v1 }
 0x2f3   :  { %v327_v3 = vmul.f32 1.442695, %v325_v2 }
 0x2f5   :  { %766 = vpow2.f32 %v327_v3 }
 0x2fe   :  { %v765_v4 = vpop.eup %764 }
 0x2ff   :  { %v334_v5 = vsel %vm318_vm1, %v765_v4, 0.0 }
 0x300   :  { %335 = vadd.xlane.f32.xlu0 %v334_v5 }
 0x302   :  { %v767_v6 = vpop.eup %766 }
 0x303   :  { %v331_v7 = vsel %vm318_vm1, %v767_v6, 0.0 }
 0x304   :  { %332 = vadd.xlane.f32.xlu1 %v331_v7 }
 0x389   :  { %v336_v9 = vpop.xlane.xlu0 %335 }
 0x38a   :  { %768 = vlog2.f32 %v336_v9 }
 0x38d   :  { %v333_v10 = vpop.xlane.xlu1 %332 }
 0x38e   :  { %770 = vlog2.f32 %v333_v10 }
 0x397   :  { %v769_v11 = vpop.eup %768 }
 0x398   :  { %v340_v12 = vmul.f32 0.6931472, %v769_v11 }
 0x39a   :  { %v342_v13 = vadd.f32 %v340_v12, %v324_v62 }
 0x39b   :  { %v771_v14 = vpop.eup %770 }
 0x39c   :  { %v344_v15 = vmul.f32 -0.5, %v342_v13  ;;  %v338_v16 = vmul.f32 0.6931472, %v771_v14 }
 0x39e   :  { %v341_v17 = vadd.f32 %v338_v16, %v321_v1  ;;  %v367_v18 = vsub.f32 0.0, %v344_v15  ;;  %v402_v41 = vsel %vm354_vm2, %v344_v15, 0.0 }
 0x3a0   :  { %v343_v19 = vmul.f32 -0.5, %v341_v17  ;;  %v369_v20 = vand.u32 2147483647, %v367_v18  ;;  %v368_v31 = vmax.f32 %v367_v18, 0.0 }
 0x3a2   :  { %v346_v21 = vand.u32 2147483647, %v343_v19  ;;  %v370_v22 = vsub.f32 0.0, %v369_v20  ;;  %v345_v35 = vmax.f32 %v343_v19, 0.0  ;;  %v390_v43 = vsel %vm354_vm2, %v343_v19, 0.0 }
 0x3a4   :  { %v347_v23 = vsub.f32 0.0, %v346_v21  ;;  %v371_v24 = vmul.f32 1.442695, %v370_v22 }
 0x3a6   :  { %v348_v25 = vmul.f32 1.442695, %v347_v23  ;;  %772 = vpow2.f32 %v371_v24 }
 0x3a8   :  { %774 = vpow2.f32 %v348_v25 }
 0x3b3   :  { %v773_v26 = vpop.eup %772 }
 0x3b4   :  { %v373_v27 = vadd.f32 1.0, %v773_v26 }
 0x3b5   :  { %v775_v28 = vpop.eup %774 }
 0x3b6   :  { %776 = vlog2.f32 %v373_v27  ;;  %v350_v29 = vadd.f32 1.0, %v775_v28 }
 0x3b8   :  { %778 = vlog2.f32 %v350_v29 }
 0x3c3   :  { %v777_v30 = vpop.eup %776 }
 0x3c4   :  { %v375_v32 = vmul.f32 0.6931472, %v777_v30 }
 0x3c5   :  { %v779_v33 = vpop.eup %778 }
 0x3c6   :  { %v376_v34 = vadd.f32 %v375_v32, %v368_v31  ;;  %v352_v36 = vmul.f32 0.6931472, %v779_v33 }
 0x3c8   :  { %v377_v37 = vsel %vm354_vm2, %v376_v34, 0.0  ;;  %v353_v38 = vadd.f32 %v352_v36, %v345_v35 }
 0x3c9   :  { %378 = vadd.xlane.f32.xlu1 %v377_v37 }
 0x3ca   :  { %v355_v40 = vsel %vm354_vm2, %v353_v38, 0.0 }
 0x3cb   :  { %356 = vadd.xlane.f32.xlu0 %v355_v40 }
 0x3cd   :  { %403 = vadd.xlane.f32.xlu1 %v402_v41 }
 0x3cf   :  { %391 = vadd.xlane.f32.xlu0 %v390_v43 }
 0x452   :  { %v379_v45 = vpop.xlane.xlu1 %378 }
 0x453   :  { %v380_v46 = vrot.slane %v379_v45, 4 }
 0x454   :  { %v357_v47 = vpop.xlane.xlu0 %356 }
 0x455   :  { %v381_v48 = vadd.f32 %v380_v46, %v379_v45  ;;  %v358_v49 = vrot.slane %v357_v47, 4 }
 0x456   :  { %v404_v50 = vpop.xlane.xlu1 %403 }
 0x457   :  { %v382_v51 = vrot.slane %v381_v48, 2  ;;  %v359_v52 = vadd.f32 %v358_v49, %v357_v47  ;;  %v405_v53 = vrot.slane %v404_v50, 4 }
 0x458   :  { %v392_v54 = vpop.xlane.xlu0 %391 }
 0x459   :  { %v360_v55 = vrot.slane %v359_v52, 2  ;;  %v406_v56 = vadd.f32 %v405_v53, %v404_v50  ;;  %v393_v57 = vrot.slane %v392_v54, 4  ;;  %v383_v58 = vadd.f32 %v382_v51, %v381_v48 }
 0x45b   :  { %v407_v59 = vrot.slane %v406_v56, 2  ;;  %v394_v60 = vadd.f32 %v393_v57, %v392_v54  ;;  %v361_v61 = vadd.f32 %v360_v55, %v359_v52  ;;  %v384_v62 = vrot.slane %v383_v58, 1 }
 0x45d   :  { %v408_v63 = vadd.f32 %v407_v59, %v406_v56  ;;  %v395_v0 = vrot.slane %v394_v60, 2  ;;  %v362_v1 = vrot.slane %v361_v61, 1  ;;  %v385_v4 = vadd.f32 %v384_v62, %v383_v58 }
 0x45f   :  { %v396_v2 = vadd.f32 %v395_v0, %v394_v60  ;;  %v363_v3 = vadd.f32 %v362_v1, %v361_v61  ;;  %v409_v5 = vrot.slane %v408_v63, 1 }
 0x461   :  { %727 = vpush %v363_v3  ;;  %v397_v6 = vrot.slane %v396_v2, 1  ;;  %v410_v9 = vadd.f32 %v409_v5, %v408_v63 }
 0x462   :  { %729 = vpush %v385_v4 }
 0x463   :  { %v398_v7 = vadd.f32 %v397_v6, %v396_v2 }
 0x465   :  { %731 = vpush %v398_v7 }
 0x466   :  { %733 = vpush %v410_v9 }
 0x492   :  { %s728_s1 = spop %727 }
 0x493   :  { %v365_v10 = vstv %s728_s1  ;;  %s730_s2 = spop %729 }
 0x494   :  { %v366_v11 = vmul.f32 0.125, %v365_v10  ;;  %v387_v12 = vstv %s730_s2 }
 0x495   :  { %v388_v13 = vmul.f32 0.125, %v387_v12 }
 0x496   :  { %s732_s3 = spop %731 }
 0x497   :  { %v946_v14 = vadd.f32 %v388_v13, %v366_v11  ;;  %v400_v15 = vstv %s732_s3  ;;  %s734_s4 = spop %733 }
 0x498   :  { %v948_v16 = vmul.f32 0.125, %v400_v15  ;;  %v412_v17 = vstv %s734_s4 }
 0x499   :  { %v950_v18 = vmul.f32 0.125, %v412_v17 }
 0x49a   :  { %793 = dma.done.wait [#allocation3], 1024 }
 0x49b   :  { %794 = vsyncadd [#allocation3], 4294966272  ;;  %707 = vmatprep.subr.bf16.mxu1 %v795_v44  ;;  %723 = vmatprep.mubr.msk.bf16.mxu1 %vm796_vm0, %v795_v44  ;;  %v781_v19 = vld [vmem:[#allocation2 + $0x38] sm:$0xff]   ;;  %v782_v20 = vld [vmem:[#allocation2 + $0x30] sm:$0xff]   ;;  %v418_v27 = vpack.c.bf16 %v929_v42, %v925_v39  ;;  %v797_v28 = vmov 0   ;;  %v528_v29 = vlaneseq }
 0x49c   :  { %708 = vmatpush3.bf16.msra.mxu1 %v781_v19  ;;  %v783_v21 = vld [vmem:[#allocation2 + $0x28] sm:$0xff]   ;;  %v784_v22 = vld [vmem:[#allocation2 + $0x20] sm:$0xff]   ;;  %v785_v23 = vld [vmem:[#allocation2 + $0x18] sm:$0xff]   ;;  %780 = vset.pattern.permute.xlu0 %v797_v28 }
 0x49d   :  { %709 = vmatprep.subr.bf16.mxu1 %v795_v44  ;;  %v786_v24 = vld [vmem:[#allocation2 + $0x10] sm:$0xff]   ;;  %v787_v25 = vld [vmem:[#allocation2 + $0x8] sm:$0xff]   ;;  %v788_v26 = vld [vmem:[#allocation2] sm:$0xff]   ;;  %v964_v30 = vand.u32 127, %v528_v29 }
 0x49e   :  { %v548_v40 = vld [vmem:[%s997_s0] sm:$0xff] }
 0x49f   :  { %vm530_vm3 = vcmp.lt.s32.totalorder %v964_v30, 10  ;;  %v581_v49 = vcvt.s32.f32 %v964_v30  ;;  %v586_v58 = vcvt.s32.f32 %v548_v40  ;;  %vm605_vm11 = vcmp.eq.s32.totalorder %v964_v30, 0 }
 0x4a0   :  { %710 = vmatpush3.bf16.msra.mxu1 %v782_v20  ;;  %vm607_vm12 = vcmp.eq.s32.totalorder %v964_v30, 1  ;;  %vm609_vm13 = vcmp.eq.s32.totalorder %v964_v30, 2  ;;  %vm611_vm14 = vcmp.eq.s32.totalorder %v964_v30, 3  ;;  %vm613_vm15 = vcmp.eq.s32.totalorder %v964_v30, 4 }
 0x4a1   :  { %711 = vmatprep.subr.bf16.mxu1 %v795_v44  ;;  %vm615_vm0 = vcmp.eq.s32.totalorder %v964_v30, 5  ;;  %vm617_vm1 = vcmp.eq.s32.totalorder %v964_v30, 6 }
 0x4a4   :  { %712 = vmatpush3.bf16.msra.mxu1 %v783_v21 }
 0x4a5   :  { %713 = vmatprep.subr.bf16.mxu1 %v795_v44 }
 0x4a8   :  { %714 = vmatpush3.bf16.msra.mxu1 %v784_v22 }
 0x4a9   :  { %715 = vmatprep.subr.bf16.mxu1 %v795_v44 }
 0x4ac   :  { %716 = vmatpush3.bf16.msra.mxu1 %v785_v23 }
 0x4ad   :  { %717 = vmatprep.subr.bf16.mxu1 %v795_v44 }
 0x4b0   :  { %718 = vmatpush3.bf16.msra.mxu1 %v786_v24  ;;  %v602_v24 = vmul.f32 0.5, %v946_v14 }
 0x4b1   :  { %719 = vmatprep.subr.bf16.mxu1 %v795_v44 }
 0x4b4   :  { %720 = vmatpush3.bf16.msra.mxu1 %v787_v25 }
 0x4b5   :  { %721 = vmatprep.subr.bf16.mxu1 %v795_v44 }
 0x4b8   :  { %722 = vmatpush3.bf16.msra.mxu1 %v788_v26 }
 0x4bb   :  { %724 = vmatmul.mubr.bf16.vlgmr.msra.gmra.mxu1 %v418_v27 }
 0x57b   :  { %v521_v31 = vpop.f32.mrf.mxu1 }
 0x57c   :  { %v522_v32 = vadd.f32 %v860_v8, %v521_v31 }
 0x57d   :  { %v725_v33 = vpop.f32.mrf.mxu1 }
 0x57e   :  { %604 = vst [vmem:[%s1003_s6] sm:$0xff] %v522_v32  ;;  %v531_v34 = vsel %vm530_vm3, %v522_v32, -1e+30  ;;  %vm532_vm4 = vcmp.ne.f32.partialorder %v522_v32, %v522_v32 }
 0x57f   :  { %555 = vmax.xlane.f32.xlu0 %v531_v34  ;;  %v524_v39 = vpop.f32.mrf.mxu1  ;;  %vm534_vm5 = vmand %vm530_vm3, %vm532_vm4 }
 0x580   :  { %v525_v42 = vadd.f32 %v860_v8, %v524_v39  ;;  %v536_v37 = vsel %vm534_vm5, 1.0, %v795_v44 }
 0x581   :  { %v726_v35 = vpop.f32.mrf.mxu1 }
 0x582   :  { %vm533_vm6 = vcmp.ne.f32.partialorder %v525_v42, %v525_v42 }
 0x583   :  { %vm535_vm7 = vmand %vm530_vm3, %vm533_vm6 }
 0x584   :  { %v537_v36 = vsel %vm535_vm7, 1.0, %v795_v44 }
 0x585   :  { %v538_v38 = vadd.f32 %v537_v36, %v536_v37 }
 0x595   :  { %550 = vperm.xlu0 %780, %v548_v40  }
 0x608   :  { %v556_v41 = vpop.xlane.xlu0 %555 }
 0x609   :  { %v557_v43 = vsub.f32 %v531_v34, %v556_v41  ;;  %vm582_vm9 = vcmp.eq.f32.partialorder %v531_v34, %v556_v41 }
 0x60a   :  { %v583_v50 = vsel %vm582_vm9, %v581_v49, 128.0 }
 0x60b   :  { %v558_v45 = vmul.f32 1.442695, %v557_v43 }
 0x60d   :  { %789 = vpow2.f32 %v558_v45 }
 0x610   :  { %v551_v46 = vpop.permute.xlu0 %550 }
 0x611   :  { %vm552_vm8 = vcmp.eq.s32.totalorder %v964_v30, %v551_v46 }
 0x612   :  { %v665_v47 = vsel %vm552_vm8, 1.0, %v795_v44 }
 0x613   :  { %v565_v48 = vmul.f32 %v665_v47, %v531_v34 }
 0x61a   :  { %v790_v8 = vpop.eup %789 }
 0x61b   :  { %560 = vadd.xlane.f32.xlu1 %v790_v8 }
 0x61f   :  { %566 = vadd.xlane.f32.xlu1 %v565_v48 }
 0x623   :  { %584 = vmin.xlane.f32.xlu1 %v583_v50 }
 0x627   :  { %539 = vadd.xlane.f32.xlu1 %v538_v38 }
 0x6a4   :  { %v561_v51 = vpop.xlane.xlu1 %560 }
 0x6a5   :  { %791 = vlog2.f32 %v561_v51 }
 0x6a8   :  { %v567_v52 = vpop.xlane.xlu1 %566 }
 0x6ac   :  { %v585_v53 = vpop.xlane.xlu1 %584 }
 0x6ad   :  { %vm587_vm10 = vcmp.eq.f32.partialorder %v585_v53, %v586_v58 }
 0x6ae   :  { %v666_v2 = vsel %vm587_vm10, 1.0, %v795_v44 }
 0x6af   :  { %v590_v4 = vsel %vm354_vm2, %v666_v2, 0.0 }
 0x6b0   :  { %v540_v54 = vpop.xlane.xlu1 %539 }
 0x6b1   :  { %v541_v55 = vrot.slane %v540_v54, 4 }
 0x6b2   :  { %v792_v56 = vpop.eup %791 }
 0x6b3   :  { %v563_v57 = vmul.f32 0.6931472, %v792_v56  ;;  %v542_v59 = vadd.f32 %v541_v55, %v540_v54 }
 0x6b5   :  { %v564_v60 = vadd.f32 %v563_v57, %v556_v41  ;;  %v543_v61 = vrot.slane %v542_v59, 2 }
 0x6b7   :  { %v568_v62 = vsub.f32 %v564_v60, %v567_v52  ;;  %v544_v63 = vadd.f32 %v543_v61, %v542_v59 }
 0x6b9   :  { %v569_v0 = vsel %vm354_vm2, %v568_v62, 0.0  ;;  %v545_v1 = vrot.slane %v544_v63, 1 }
 0x6ba   :  { %570 = vadd.xlane.f32.xlu1 %v569_v0 }
 0x6bb   :  { %v546_v3 = vadd.f32 %v545_v1, %v544_v63 }
 0x6bd   :  { %735 = vpush %v546_v3 }
 0x6be   :  { %591 = vadd.xlane.f32.xlu1 %v590_v4 }
 0x6ee   :  { %s736_s0 = spop %735 }
 0x6ef   :  { %v618_v34 = vstv %s736_s0 }
 0x743   :  { %v571_v5 = vpop.xlane.xlu1 %570 }
 0x744   :  { %v572_v6 = vrot.slane %v571_v5, 4 }
 0x746   :  { %v573_v7 = vadd.f32 %v572_v6, %v571_v5 }
 0x747   :  { %v592_v9 = vpop.xlane.xlu1 %591 }
 0x748   :  { %v574_v10 = vrot.slane %v573_v7, 2  ;;  %v593_v11 = vrot.slane %v592_v9, 4 }
 0x74a   :  { %v594_v12 = vadd.f32 %v593_v11, %v592_v9  ;;  %v575_v13 = vadd.f32 %v574_v10, %v573_v7 }
 0x74c   :  { %v595_v15 = vrot.slane %v594_v12, 2  ;;  %v576_v17 = vrot.slane %v575_v13, 1 }
 0x74e   :  { %v596_v19 = vadd.f32 %v595_v15, %v594_v12  ;;  %v577_v20 = vadd.f32 %v576_v17, %v575_v13 }
 0x750   :  { %737 = vpush %v577_v20  ;;  %v597_v21 = vrot.slane %v596_v19, 1 }
 0x752   :  { %v598_v44 = vadd.f32 %v597_v21, %v596_v19 }
 0x754   :  { %739 = vpush %v598_v44 }
 0x781   :  { %s738_s11 = spop %737 }
 0x782   :  { %v579_v22 = vstv %s738_s11 }
 0x783   :  { %v580_v23 = vmul.f32 0.125, %v579_v22 }
 0x785   :  { %s740_s12 = spop %739  ;;  %v606_v27 = vsel %vm605_vm11, %v580_v23, 0.0  ;;  %v603_v28 = vadd.f32 %v602_v24, %v580_v23 }
 0x786   :  { %v600_v25 = vstv %s740_s12 }
 0x787   :  { %v601_v26 = vmul.f32 0.125, %v600_v25 }
 0x789   :  { %v608_v29 = vsel %vm607_vm12, %v601_v26, %v606_v27 }
 0x78a   :  { %v610_v31 = vsel %vm609_vm13, %v946_v14, %v608_v29 }
 0x78b   :  { %v612_v32 = vsel %vm611_vm14, %v603_v28, %v610_v31 }
 0x78c   :  { %v614_v33 = vsel %vm613_vm15, %v948_v16, %v612_v32 }
 0x78d   :  { %v616_v39 = vsel %vm615_vm0, %v950_v18, %v614_v33 }
 0x78e   :  { %v619_v42 = vsel %vm617_vm1, %v618_v34, %v616_v39 }
 0x78f   :  { %620 = vst [vmem:[%s1003_s6 + $0x8] sm:$0xff] %v619_v42 }
 0x790   :  { %625 = vsyncmov [#allocation3] }
 0x793   :  { %s626_s15 = vpop.sfrf %625 }
 0x794   :  { %p667_p0 = scmp.ne.s32.totalorder %s626_s15, 0 }
 0x796   :  { %630 = shalt.err (%p667_p0)  }

</bundles_post_ra>
